<compile_context>
chip_gen: v5e
topology: v5e:2x2
jax: 0.10.0
libtpu: 0.0.40
codegen_flags: <defaults>
</compile_context>

<pallas_src>
import jax
import jax.numpy as jnp
from jax.experimental import pallas as pl
from jax.experimental.pallas import tpu as pltpu

_LANES = 128
_SUBLANES_F32 = 8
_BLOCK_BYTES = 2 * 1024 * 1024      # per-block target; 4 x block <= 8 MiB double-buffered
_MIN_BLOCK_BYTES = 256 * 1024       # never shrink below this when adding grid steps
_MIN_GRID_STEPS = 8                 # enough parallel steps for v7x 2-TC megacore


def _cdiv(a, b):
    return -(-a // b)


def _round_down(a, b):
    return (a // b) * b


def _sublane_multiple(dtype_bytes):
    # Native vreg tile is (8,128) x 32-bit; sub-32-bit dtypes pack along sublanes.
    return _SUBLANES_F32 * max(1, 4 // dtype_bytes)


# ----------------------------------------------------------------------------
# Path A: M % 128 == 0.  View x as (C, R, 128); each grid step is a dense
# (rows, 128) tile of one channel.  Per-channel scalars come from SMEM.
# ----------------------------------------------------------------------------
def _norm_rows_kernel(mean_ref, inv_ref, x_ref, o_ref):
    c = pl.program_id(0)
    xf = x_ref[...].astype(jnp.float32)
    o_ref[...] = ((xf - mean_ref[c]) * inv_ref[c]).astype(o_ref.dtype)


def _normalize_lane_aligned(x2d, means_f32, inv_f32):
    C, M = x2d.shape
    dtype_bytes = x2d.dtype.itemsize
    sub = _sublane_multiple(dtype_bytes)
    R = M // _LANES
    x3 = x2d.reshape(C, R, _LANES)

    # Largest multiple-of-sub row count within the 2 MiB budget, clipped to R.
    rows = _round_down(_BLOCK_BYTES // (_LANES * dtype_bytes), sub)
    rows = min(rows, _round_down(R, sub))
    if rows == 0:
        # R < sub: use the full (small) extent; block dim == array dim is legal.
        rows = R
    else:
        # v7x megacore: make sure there are enough parallel steps, but never
        # shrink below ~256 KiB blocks (per-step overhead would dominate).
        min_rows = max(sub, _round_down(_MIN_BLOCK_BYTES // (_LANES * dtype_bytes), sub))
        while C * _cdiv(R, rows) < _MIN_GRID_STEPS and rows >= 2 * min_rows:
            rows = _round_down(rows // 2, sub)

    grid = (C, _cdiv(R, rows))       # tail block along R is masked by Pallas
    blk = (None, rows, _LANES)       # channel dim squeezed out of the Ref
    idx = lambda c, r, mean_ref, inv_ref: (c, r, 0)

    out3 = pl.pallas_call(
        _norm_rows_kernel,
        out_shape=jax.ShapeDtypeStruct((C, R, _LANES), x2d.dtype),
        grid_spec=pltpu.PrefetchScalarGridSpec(
            num_scalar_prefetch=2,
            grid=grid,
            in_specs=[pl.BlockSpec(blk, idx)],
            out_specs=pl.BlockSpec(blk, idx),
        ),
        compiler_params=pltpu.CompilerParams(
            dimension_semantics=("parallel", "parallel")),
        cost_estimate=pl.CostEstimate(
            flops=2 * C * M, transcendentals=0,
            bytes_accessed=2 * C * M * dtype_bytes),
    )(means_f32, inv_f32, x3)
    return out3.reshape(C, M)


# ----------------------------------------------------------------------------
# Path B: M % 128 != 0.  Keep x 2-D (C, M); each grid step is a (C, BLOCK_L)
# tile spanning all channels, tail lanes masked by Pallas (no pad, no slice).
# Per-channel constants are a tiny resident (C, 1) f32 VMEM block.
# ----------------------------------------------------------------------------
def _norm_cols_kernel(mean_ref, inv_ref, x_ref, o_ref):
    xf = x_ref[...].astype(jnp.float32)
    o_ref[...] = ((xf - mean_ref[...]) * inv_ref[...]).astype(o_ref.dtype)


def _normalize_lane_masked(x2d, means_f32, inv_f32):
    C, M = x2d.shape
    dtype_bytes = x2d.dtype.itemsize
    sub = _sublane_multiple(dtype_bytes)
    c_pad = _cdiv(C, sub) * sub      # sublane footprint of a (C, BLOCK_L) VMEM tile

    m_lanes = _round_down(M, _LANES)
    if m_lanes == 0:
        block_l = M                  # M < 128: full-extent block (== array dim)
    else:
        block_l = max(_LANES, _round_down(_BLOCK_BYTES // (c_pad * dtype_bytes), _LANES))
        block_l = min(block_l, m_lanes)
        min_l = max(_LANES, _round_down(_MIN_BLOCK_BYTES // (c_pad * dtype_bytes), _LANES))
        while _cdiv(M, block_l) < _MIN_GRID_STEPS and block_l >= 2 * min_l:
            block_l = _round_down(block_l // 2, _LANES)

    grid = (_cdiv(M, block_l),)      # tail block along M is masked by Pallas
    m2 = means_f32.reshape(C, 1)
    i2 = inv_f32.reshape(C, 1)

    out = pl.pallas_call(
        _norm_cols_kernel,
        out_shape=jax.ShapeDtypeStruct((C, M), x2d.dtype),
        grid=grid,
        in_specs=[pl.BlockSpec((C, 1), lambda j: (0, 0)),
                  pl.BlockSpec((C, 1), lambda j: (0, 0)),
                  pl.BlockSpec((C, block_l), lambda j: (0, j))],
        out_specs=pl.BlockSpec((C, block_l), lambda j: (0, j)),
        compiler_params=pltpu.CompilerParams(
            dimension_semantics=("parallel",)),
        cost_estimate=pl.CostEstimate(
            flops=2 * C * M, transcendentals=0,
            bytes_accessed=2 * C * M * dtype_bytes),
    )(m2, i2, x2d)
    return out


# ----------------------------------------------------------------------------
# Public wrapper mirroring PreprocesNormalization.forward.
# ----------------------------------------------------------------------------
def preprocess_normalization(x, means, stds):
    """(x - means) / stds with means/stds broadcast as (-1, 1, 1, 1) over x (C,D,H,W)."""
    C = x.shape[0]
    M = 1
    for s in x.shape[1:]:
        M *= s
    if M == 0:
        return x

    means_f32 = jnp.asarray(means, jnp.float32).reshape(C)
    # Exact wrapper-side reciprocal (O(C)); kernel uses multiply instead of a
    # per-element divide.  Differs from true division by <= ~1 ulp per element.
    inv_f32 = 1.0 / jnp.asarray(stds, jnp.float32).reshape(C)

    x2d = x.reshape(C, M)            # free reshape; no padding, no copy
    if M % _LANES == 0:
        out2d = _normalize_lane_aligned(x2d, means_f32, inv_f32)
    else:
        out2d = _normalize_lane_masked(x2d, means_f32, inv_f32)
    return out2d.reshape(x.shape)


if __name__ == "__main__":
    key = jax.random.PRNGKey(0)
    k_x, k_m, k_s = jax.random.split(key, 3)

    def _check(shape):
        C = shape[0]
        x = jax.random.normal(k_x, shape, dtype=jnp.float32)
        means = jax.random.normal(k_m, (C,), dtype=jnp.float32)
        stds = jax.random.uniform(k_s, (C,), dtype=jnp.float32, minval=0.5, maxval=2.0)
        out = jax.block_until_ready(preprocess_normalization(x, means, stds))
        ref = (x - means.reshape(C, 1, 1, 1)) / stds.reshape(C, 1, 1, 1)
        assert out.shape == x.shape and out.dtype == x.dtype
        assert jnp.allclose(out, ref, rtol=1e-5, atol=1e-6), shape

    _check((4, 2, 16, 16))   # M=512: lane-aligned, R=4 < 8 -> full-extent sublane block
    _check((3, 8, 32, 64))   # M=16384: lane-aligned, tiled (rows,128) blocks, cdiv grid
    _check((5, 2, 10, 10))   # M=200: not lane-aligned -> lane-masked 2-D path, no pad/slice

    print("KERNEL_OK")
</pallas_src>

<mosaic_0001>
module attributes {stable_mosaic.version = 11 : i64} {
  func.func @_norm_rows_kernel(%arg0: i32, %arg1: i32, %arg2: memref<4xf32, #tpu.memory_space<smem>>, %arg3: memref<4xf32, #tpu.memory_space<smem>>, %arg4: memref<1x4x128xf32, #tpu.memory_space<vmem>>, %arg5: memref<1x4x128xf32, #tpu.memory_space<vmem>>) attributes {dimension_semantics = [#tpu.dimension_semantics<parallel>, #tpu.dimension_semantics<parallel>], iteration_bounds = array<i64: 4, 1>, scalar_prefetch = 2 : i64, scratch_operands = 0 : i64, tpu.core_type = #tpu.core_type<tc>, window_params = [{transform_indices = @transform_0, window_bounds = array<i64: 1, 4, 128>}, {transform_indices = @transform_1, window_bounds = array<i64: 1, 4, 128>}]} {
    %c0 = arith.constant 0 : index
    %c0_0 = arith.constant 0 : index
    %c0_1 = arith.constant 0 : index
    %0 = vector.load %arg4[%c0, %c0_0, %c0_1] : memref<1x4x128xf32, #tpu.memory_space<vmem>>, vector<1x4x128xf32>
    %1 = vector.shape_cast %0 : vector<1x4x128xf32> to vector<4x128xf32>
    %2 = arith.index_cast %arg0 : i32 to index
    %3 = memref.load %arg2[%2] : memref<4xf32, #tpu.memory_space<smem>>
    %4 = vector.broadcast %3 : f32 to vector<4x128xf32>
    %5 = arith.subf %1, %4 : vector<4x128xf32>
    %6 = arith.index_cast %arg0 : i32 to index
    %7 = memref.load %arg3[%6] : memref<4xf32, #tpu.memory_space<smem>>
    %8 = vector.broadcast %7 : f32 to vector<4x128xf32>
    %9 = arith.mulf %5, %8 : vector<4x128xf32>
    %c0_2 = arith.constant 0 : index
    %c0_3 = arith.constant 0 : index
    %c0_4 = arith.constant 0 : index
    %10 = vector.load %arg5[%c0_2, %c0_3, %c0_4] : memref<1x4x128xf32, #tpu.memory_space<vmem>>, vector<1x4x128xf32>
    %11 = vector.shape_cast %10 : vector<1x4x128xf32> to vector<4x128xf32>
    %12 = vector.shape_cast %9 : vector<4x128xf32> to vector<1x4x128xf32>
    tpu.vector_store %arg5[%c0_2, %c0_3, %c0_4], %12 {strides = array<i32>} : memref<1x4x128xf32, #tpu.memory_space<vmem>>, vector<1x4x128xf32>,
    return
  }
  func.func @transform_0(%arg0: i32, %arg1: i32, %arg2: memref<4xf32, #tpu.memory_space<smem>>, %arg3: memref<4xf32, #tpu.memory_space<smem>>) -> (i32, i32, i32) {
    %c0_i32 = arith.constant 0 : i32
    %c0_i32_0 = arith.constant 0 : i32
    return %arg0, %arg1, %c0_i32 : i32, i32, i32
  }
  func.func @transform_1(%arg0: i32, %arg1: i32, %arg2: memref<4xf32, #tpu.memory_space<smem>>, %arg3: memref<4xf32, #tpu.memory_space<smem>>) -> (i32, i32, i32) {
    %c0_i32 = arith.constant 0 : i32
    %c0_i32_0 = arith.constant 0 : i32
    return %arg0, %arg1, %c0_i32 : i32, i32, i32
  }
}

</mosaic_0001>

<bundles_post_ra>
// kernel: tpu_custom_call.1
= control target key start
LH: loop header
LB: loop body
LE: loop exit
PB: predicated region body
PF: predicated region fallthrough
CT: control target
= control target key end

     0   :  { %s488_s18 = smov [#allocation3]   ;;  %s489_s19 = smov [#allocation4]   ;;  %s636_s0 = inlined_call_operand.hbm [shape: f32[4], index: 0, kind: input, shape index: {}]   ;;  %s637_s2 = inlined_call_operand.hbm [shape: f32[4,4,128], index: 2, kind: input, shape index: {}]   ;;  %s638_s3 = inlined_call_operand.hbm [shape: f32[4,4,128], index: 3, kind: output, shape index: {}]   ;;  %s639_s1 = inlined_call_operand.hbm [shape: f32[4], index: 1, kind: input, shape index: {}]  }
   0x1   :  { %s9_s14 = sshll.u32 %s636_s0, 4  ;;  %s14_s17 = sshll.u32 %s639_s1, 4  ;;  %s10_s14 = int_to_ptr.hbm [resolvable:$true] %s9_s14  ;;  %s15_s17 = int_to_ptr.hbm [resolvable:$true] %s14_s17 }
   0x2   :  { %12 = dma.hbm_to_smem %s10_s14, 16, %s488_s18, [#allocation2] }
   0x3   :  { %17 = dma.hbm_to_smem %s15_s17, 16, %s489_s19, [#allocation2] }
   0x4   :  { %454 = dma.done.wait [#allocation2], 32 }
   0x5   :  { %455 = vsyncadd [#allocation2], 4294967264 }
   0x6   :  { %20 = sfence }
   0x7   :  { %21 = vsyncpa [#allocation6], 0 }
   0x8   :  { %23 = vsyncpa [#allocation6 + $0x1], 0 }
   0x9   :  { %24 = vsyncpa [#allocation7], 0 }
   0xa   :  { %26 = vsyncpa [#allocation7 + $0x1], 0  ;;  %s516_s20 = smov 0   ;;  %s518_s0 = smov 0  }
   0xb   :  { %s520_s21 = smov 0   ;;  %s522_s1 = smov 0  }
   0xc   :  { %s524_s22 = smov 0   ;;  %s526_s23 = smov 0  }
   0xd LB: > { %s271_s24 = sadd.s32 4294967295, %s486_s23   ;;  %s272_s25 = sadd.s32 4294967294, %s486_s23   ;;  %s486_s23 = sphi %s526_s23, %s32_s23   ;;  %s482_s22 = sphi %s524_s22, %s648_s22   ;;  %s478_s1 = sphi %s522_s1, %s647_s1   ;;  %s474_s21 = sphi %s520_s21, %s646_s21   ;;  %s470_s0 = sphi %s518_s0, %s645_s0   ;;  %s466_s20 = sphi %s516_s20, %s644_s20  }
   0xe   : > { %s44_s26 = sadd.s32 1, %s482_s22  ;;  %s53_s27 = sadd.s32 1, %s474_s21 }
   0xf   : > { %p46_p0 = scmp.ge.s32.totalorder %s44_s26, 4  ;;  %p60_p1 = scmp.ne.s32.totalorder %s474_s21, %s470_s0 }
  0x10   : > { %p61_p2 = scmp.eq.s32.totalorder %s486_s23, 0  ;;  %p66_p3 = scmp.ne.s32.totalorder %s470_s0, %s466_s20 }
  0x11   : > { %s650_s26 = smov (%p46_p0, %s44_s26), 0  ;;  %p67_p5 = scmp.eq.s32.totalorder %s271_s24, 0 }
  0x12   : > { %p557_p4 = por %p61_p2, %p60_p1  ;;  %s48_s29 = ssub.s32 %s482_s22, %s650_s26 }
  0x13   : > { %p92_p6 = scmp.eq.s32.totalorder %s271_s24, 3  ;;  %p51_p7 = scmp.eq.s32.totalorder %s48_s29, 0 }
  0x14   : > { %p563_p8 = por %p67_p5, %p66_p3  ;;  %p98_p10 = scmp.eq.s32.totalorder %s272_s25, 3 }
  0x15   : > { %p567_p9 = por %p92_p6, %p60_p1  ;;  %p296_p12 = scmp.lt.s32.totalorder %s486_s23, 4 }
  0x16   : > { %s572_s5 = scalar_select %p51_p7, %s474_s21, %s53_s27  }
  0x17   : > { %p574_p11 = por %p98_p10, %p66_p3  ;;  %s118_s7 = sand.u32 1, %s474_s21  }
  0x18   : > { %s275_s8 = sshll.u32 %s118_s7, 2  ;;  %s276_s9 = sshll.u32 %s482_s22, 2 }
  0x19   : > { %s127_s12 = scalar_lea.hbm %s637_s2, %s276_s9  ;;  %s122_s13 = scalar_lea.vmem [#allocation5], %s275_s8 }
  0x1a   : > { %s131_s14 = sshll.u32 %s122_s13, 4  ;;  %s129_s15 = sshll.u32 %s127_s12, 4  ;;  %s132_s14 = int_to_ptr.vmem [resolvable:$true] %s131_s14  ;;  %s130_s15 = int_to_ptr.hbm [resolvable:$true] %s129_s15 }
  0x1b   : > { %p289_p13 = pnand %p296_p12, %p557_p4  ;;  %p277_p0 = scmp.ge.s32.totalorder %s486_s23, 1 }
  0x1c   : > { %p136_p1 = scmp.lt.s32.totalorder %s486_s23, 5  ;;  %s119_s16 = scalar_lea.sflag [#allocation6], %s118_s7 }
  0x1d   : > { %291 = dma.hbm_to_vmem [thread:$0]  (!%p289_p13), %s130_s15, 64, %s132_s14, %s119_s16  }
  0x1e   : > { %p137_p2 = pnand %p277_p0, %p136_p1 }
  0x1f   : > { %s589_s17 = sand.u32 (!%p137_p2), 1, %s470_s0  }
  0x20   : > { %140 = sbr.rel (%p137_p2) target bundleno = 54 (0x36), region = 24  ;;  %s278_s18 = sshll.u32 (!%p137_p2), %s589_s17, 2 }
  0x21   : > { %s143_s19 = scalar_lea.sflag (!%p137_p2), [#allocation6], %s589_s17  ;;  %s146_s24 = scalar_lea.vmem (!%p137_p2), [#allocation5], %s278_s18 }
  0x25   : > { %457 = dma.done.wait (%p563_p8), %s143_s19, 64  }
  0x26   : > { %459 = vsyncadd (%p563_p8), %s143_s19, 4294967232  ;;  %s167_s25 = sld [smem:[#allocation3 + %s478_s1]]  ;;  %s281_s28 = sshll.u32 %s478_s1, 2  ;;  %v166_v0 = vld [vmem:[%s146_s24] sm:$0xf] }
  0x27   : > { %s170_s27 = sld [smem:[#allocation4 + %s478_s1]]  ;;  %s186_s8 = scalar_lea.hbm %s638_s3, %s281_s28 }
  0x28   : > { %s165_s9 = scalar_lea.vmem [#allocation8], %s278_s18  ;;  %s190_s11 = sshll.u32 %s186_s8, 4  ;;  %s191_s11 = int_to_ptr.hbm [resolvable:$true] %s190_s11 }
  0x29   : > { %s188_s10 = sshll.u32 %s165_s9, 4  ;;  %s175_s30 = scalar_lea.sflag [#allocation7], %s589_s17  ;;  %s189_s10 = int_to_ptr.vmem [resolvable:$true] %s188_s10 }
  0x2a   : > { %s416_s12 = sshra.s32 %s191_s11, 4  ;;  %s422_s15 = scalar_lea.hbm %s638_s3, 16  ;;  %s417_s12 = int_to_ptr.hbm [resolvable:$true] %s416_s12 }
  0x2b   : > { %s418_s1 = scalar_lea.hbm %s417_s12, 4  ;;  %p423_p6 = scmp.lt.s32.totalorder %s417_s12, %s638_s3 }
  0x2c   : > { %v168_v1 = vstv %s167_s25  ;;  %p419_p3 = scmp.ne.s32.totalorder %s417_s12, %s418_s1  ;;  %p424_p7 = scmp.lt.s32.totalorder %s422_s15, %s418_s1 }
  0x2d   : > { %v169_v2 = vsub.f32 %v166_v0, %v168_v1  ;;  %v171_v3 = vstv %s170_s27 }
  0x2e   : > { %p420_p4 = pnand %p419_p3, %p567_p9  ;;  %p425_p8 = por %p424_p7, %p423_p6 }
  0x2f   : > { %v172_v4 = vmul.f32 %v171_v3, %v169_v2 }
  0x30   : > { %p421_p5 = pneg %p420_p4 }
  0x31   : > { %173 = vst [vmem:[%s165_s9] sm:$0xf] %v172_v4 }
  0x32   : > { %p426_p10 = pnand %p425_p8, %p421_p5 }
  0x34   : > { %429 = shalt.err (!%p426_p10)
}
  0x35   : > { %286 = dma.vmem_to_hbm [thread:$0]  (%p567_p9), %s189_s10, 64, %s191_s11, %s175_s30  }
  0x36 PF: > { %p297_p12 = scmp.ge.s32.totalorder %s486_s23, 2  ;;  %s202_s17 = sand.u32 1, %s466_s20  }
  0x37   : > { %s203_s19 = scalar_lea.sflag [#allocation7], %s202_s17 }
  0x38   : > { %p293_p13 = pnand %p297_p12, %p574_p11 }
  0x3a   : > { %p294_p0 = pneg %p293_p13 }
  0x3c   : > { %461 = dma.done.wait (%p294_p0), %s203_s19, 64  }
  0x3d   : > { %463 = vsyncadd (%p294_p0), %s203_s19, 4294967232  ;;  %s32_s23 = sadd.s32 1, %s486_s23   ;;  %s644_s20 = smov %s470_s0 }
  0x3e   : > { %p29_p1 = scmp.ge.s32.totalorder %s32_s23, 6   ;;  %s645_s0 = smov %s474_s21 }
  0x3f   : > { %s646_s21 = smov %s572_s5  ;;  %s647_s1 = smov %s482_s22 }
  0x40   : > { %s648_s22 = smov %s650_s26  ;;  %31 = sbr.rel (!%p29_p1) target bundleno = 13 (0xd), region = 69 }
  0x45   :  { %209 = vsyncpa [#allocation6], 1 }
  0x46   :  { %211 = vsyncpa [#allocation6 + $0x1], 1 }
  0x47   :  { %212 = vsyncpa [#allocation7], 1 }
  0x48   :  { %214 = vsyncpa [#allocation7 + $0x1], 1 }

</bundles_post_ra>
